<compile_context>
chip_gen: v6e
topology: v6e:2x2x1
jax: 0.10.0
libtpu: 0.0.40
codegen_flags: <defaults>
</compile_context>

<pallas_src>
import math

import jax
import jax.numpy as jnp
from jax.experimental import pallas as pl
from jax.experimental.pallas import tpu as pltpu

_NEG_INF = -1e30


def _classifier_kernel(x_ref, w_ref, b_ref, o_ref):
    # x tile: (TILE_B, D) in its native dtype; cast to bf16 for the MXU.
    x = x_ref[...].astype(jnp.bfloat16)          # (TILE_B, D)
    w = w_ref[...]                               # (D, O_pad) bf16, VMEM-resident
    b = b_ref[...]                               # (1, O_pad) f32; padded classes = -1e30

    logits = jnp.dot(x, w, preferred_element_type=jnp.float32) + b   # (TILE_B, O_pad) f32

    # numerically stable log_softmax over the lane axis, all in f32
    m = jnp.max(logits, axis=-1, keepdims=True)
    shifted = logits - m
    lse = jnp.log(jnp.sum(jnp.exp(shifted), axis=-1, keepdims=True))
    o_ref[...] = (shifted - lse).astype(o_ref.dtype)


def _round_up(n, m):
    return ((n + m - 1) // m) * m


def _vmem_cap_bytes():
    """~80% of the physical per-core VMEM (leaves compiler-scratch headroom)."""
    try:
        phys = int(pltpu.get_tpu_info().vmem_capacity_bytes)
    except Exception:
        phys = 64 << 20   # conservative fallback (v7x per-TC size)
    return max(int(phys * 0.80), 16 << 20)


def _pick_tile_b(b_pad, target):
    """Largest multiple-of-8 divisor of b_pad that is <= target.

    Exact tiling => no large batch pad copy.  When b_pad >= 16 we also keep at
    least 2 grid steps so the "parallel" batch axis can shard across both
    TensorCores on v7x.
    """
    cap = min(max(target, 8), b_pad)
    if b_pad >= 16:
        cap = min(cap, b_pad // 2)
    cap = max(cap, 8)
    best, t = 8, 8
    while t <= cap:
        if b_pad % t == 0:
            best = t
        t += 8
    return best


def prepare_classifier_params(w, b):
    """One-time weight/bias prep (hoist & cache when weights are static).

    w: (input_size, output_size) f32, b: (output_size,) f32
    Returns bf16 weight padded to lane-dense O_pad and an f32 bias row whose
    padded entries are -1e30 (they vanish in the log-sum-exp).
    """
    D, O = w.shape
    # O<=128 -> 128 (one MXU pass on v5e); larger heads -> multiple of 256 (v6e/v7x N width)
    O_pad = 128 if O <= 128 else _round_up(O, 256)
    w_p = jnp.zeros((D, O_pad), dtype=jnp.bfloat16).at[:, :O].set(w.astype(jnp.bfloat16))
    b_p = jnp.full((1, O_pad), _NEG_INF, dtype=jnp.float32).at[:, :O].set(
        b.reshape(1, O).astype(jnp.float32))
    return w_p, b_p


def vanilla_classifier_forward(x, w_p, b_p, num_classes, *, tile_b=512,
                               out_dtype=jnp.float32):
    """x: (B, ...) any trailing shape; w_p/b_p from prepare_classifier_params."""
    B = x.shape[0]
    x2d = x.reshape(B, -1)                       # glue: flatten like x.view(B, -1); keep dtype
    D, O_pad = w_p.shape
    assert x2d.shape[1] == D, f"flattened input dim {x2d.shape[1]} != weight fan_in {D}"
    # TODO(synk): for very large flattened D (>~16k) add a K-reduction grid axis with an
    # f32 VMEM accumulator instead of keeping the full-D x tile + weight resident (v7x VMEM).

    x_itemsize = x2d.dtype.itemsize
    out_itemsize = jnp.dtype(out_dtype).itemsize

    # --- VMEM-aware batch-tile sizing -------------------------------------------------
    cap = _vmem_cap_bytes()
    fixed_bytes = D * O_pad * 2 + O_pad * 4 + (4 << 20)          # resident bf16 W, f32 b, slack
    # double-buffered x & out tiles + ~3 f32 intermediates (logits/shifted/exp) per row
    per_row_bytes = 2 * D * x_itemsize + 2 * O_pad * out_itemsize + 3 * O_pad * 4
    rows_fit = max(((cap - fixed_bytes) // per_row_bytes) // 8 * 8, 8)
    tile_target = int(min(tile_b, rows_fit))

    # Batch padded only up to a multiple of 8 (<= 7 rows); tile_b divides B_pad exactly,
    # so there is never a full-array jnp.pad copy of x.
    B_pad = _round_up(B, 8)
    tile_b = _pick_tile_b(B_pad, tile_target)
    if B_pad != B:
        x2d = jnp.pad(x2d, ((0, B_pad - B), (0, 0)))

    budget = (2 * tile_b * (D * x_itemsize + O_pad * out_itemsize)
              + 3 * tile_b * O_pad * 4 + fixed_bytes)
    vmem_limit = int(min(max(budget, 32 << 20), cap))

    grid = (B_pad // tile_b,)
    out = pl.pallas_call(
        _classifier_kernel,
        out_shape=jax.ShapeDtypeStruct((B_pad, O_pad), out_dtype),
        grid_spec=pl.GridSpec(
            grid=grid,
            in_specs=[
                pl.BlockSpec((tile_b, D), lambda i: (i, 0)),   # x tile marches over B
                pl.BlockSpec((D, O_pad), lambda i: (0, 0)),    # weight stays resident
                pl.BlockSpec((1, O_pad), lambda i: (0, 0)),    # bias stays resident
            ],
            out_specs=pl.BlockSpec((tile_b, O_pad), lambda i: (i, 0)),
        ),
        compiler_params=pltpu.CompilerParams(
            dimension_semantics=("parallel",),
            vmem_limit_bytes=vmem_limit,
        ),
        cost_estimate=pl.CostEstimate(
            flops=2 * B_pad * D * O_pad,
            transcendentals=B_pad * O_pad,
            bytes_accessed=(B_pad * D * x_itemsize
                            + D * O_pad * 2 + O_pad * 4
                            + B_pad * O_pad * out_itemsize),
        ),
    )(x2d, w_p, b_p)

    # Strip batch / class padding (glue).
    return out[:B, :num_classes]


def vanilla_classifier_apply(x, w, b, **kwargs):
    """Convenience: prep + forward in one call (use prepare_* + forward to cache prep)."""
    w_p, b_p = prepare_classifier_params(w, b)
    return vanilla_classifier_forward(x, w_p, b_p, b.shape[0], **kwargs)


def init_params(key, input_size, output_size):
    """Deterministic param init mirroring the module's __init__.

    Weight: tf.keras VarianceScaling(scale=0.1, mode='fan_in',
            distribution='truncated_normal') over shape (input_size, output_size);
            kept as (input_size, output_size) so the kernel can do x @ w directly.
    Bias:   PyTorch nn.Linear default uniform(-1/sqrt(fan_in), 1/sqrt(fan_in)).
    """
    kw, kb = jax.random.split(key)
    stddev = math.sqrt(0.1 / input_size) / 0.87962566103423978
    w = stddev * jax.random.truncated_normal(
        kw, -2.0, 2.0, (input_size, output_size), dtype=jnp.float32)
    bound = 1.0 / math.sqrt(input_size)
    b = jax.random.uniform(kb, (output_size,), minval=-bound, maxval=bound,
                           dtype=jnp.float32)
    return w, b


if __name__ == "__main__":
    key = jax.random.PRNGKey(0)
    k_x, k_p = jax.random.split(key)

    # Small shapes: batch=2, feature map (4, 16, 16) flattens to input_size=1024,
    # output_size (num classes) = 10.
    B, C, H, W = 2, 4, 16, 16
    input_size = C * H * W
    output_size = 10

    x = jax.random.normal(k_x, (B, C, H, W), dtype=jnp.float32)
    w, b = init_params(k_p, input_size, output_size)

    # Weight/bias prep hoisted out of the per-call path (cacheable for static weights).
    w_p, b_p = prepare_classifier_params(w, b)

    out = vanilla_classifier_forward(x, w_p, b_p, output_size)
    out = jax.block_until_ready(out)

    assert out.shape == (B, output_size)

    # rows of log_softmax exponentiate & sum to ~1 (padded classes contribute 0)
    row_sums = jnp.exp(out).sum(axis=1)
    assert bool(jnp.all(jnp.abs(row_sums - 1.0) < 1e-3))

    # loose check vs pure-JAX f32 reference (kernel uses bf16 MXU operands)
    ref = jax.nn.log_softmax(x.reshape(B, -1) @ w + b, axis=-1)
    assert bool(jnp.max(jnp.abs(out - ref)) < 5e-2)

    # convenience one-shot path gives the same result
    out2 = jax.block_until_ready(vanilla_classifier_apply(x, w, b))
    assert bool(jnp.max(jnp.abs(out - out2)) < 1e-6)

    print("KERNEL_OK")
</pallas_src>

<mosaic_0001>
module attributes {stable_mosaic.version = 11 : i64} {
  func.func @_classifier_kernel(%arg0: i32, %arg1: memref<8x1024xf32, #tpu.memory_space<vmem>>, %arg2: memref<1024x128xbf16, #tpu.memory_space<vmem>>, %arg3: memref<1x128xf32, #tpu.memory_space<vmem>>, %arg4: memref<8x128xf32, #tpu.memory_space<vmem>>) attributes {dimension_semantics = [#tpu.dimension_semantics<parallel>], iteration_bounds = array<i64: 1>, scalar_prefetch = 0 : i64, scratch_operands = 0 : i64, tpu.core_type = #tpu.core_type<tc>, window_params = [{transform_indices = @transform_0, window_bounds = array<i64: 8, 1024>}, {pipeline_mode = #tpu.pipeline_mode<synchronous>, transform_indices = @transform_1, window_bounds = array<i64: 1024, 128>}, {pipeline_mode = #tpu.pipeline_mode<synchronous>, transform_indices = @transform_2, window_bounds = array<i64: 1, 128>}, {transform_indices = @transform_3, window_bounds = array<i64: 8, 128>}]} {
    %c0 = arith.constant 0 : index
    %c0_0 = arith.constant 0 : index
    %0 = vector.load %arg1[%c0, %c0_0] : memref<8x1024xf32, #tpu.memory_space<vmem>>, vector<8x1024xf32>
    %1 = arith.truncf %0 : vector<8x1024xf32> to vector<8x1024xbf16>
    %c0_1 = arith.constant 0 : index
    %c0_2 = arith.constant 0 : index
    %2 = vector.load %arg2[%c0_1, %c0_2] : memref<1024x128xbf16, #tpu.memory_space<vmem>>, vector<1024x128xbf16>
    %c0_3 = arith.constant 0 : index
    %c0_4 = arith.constant 0 : index
    %3 = vector.load %arg3[%c0_3, %c0_4] : memref<1x128xf32, #tpu.memory_space<vmem>>, vector<1x128xf32>
    %cst = arith.constant dense<0.000000e+00> : vector<8x128xf32>
    %4 = tpu.matmul %1, %2, %cst {dimension_numbers = #tpu.dot_dimension_numbers<[1], [0], [0], [1], [0, 0, 1, 1], [], []>} : vector<8x1024xbf16>, vector<1024x128xbf16>, vector<8x128xf32> -> vector<8x128xf32>
    %5 = vector.broadcast %3 : vector<1x128xf32> to vector<8x128xf32>
    %6 = arith.addf %4, %5 : vector<8x128xf32>
    %cst_5 = arith.constant dense<0xFF800000> : vector<8xf32>
    %7 = vector.multi_reduction <maximumf>, %6, %cst_5 [1] : vector<8x128xf32> to vector<8xf32>
    %8 = vector.shape_cast %7 : vector<8xf32> to vector<8x1xf32>
    %9 = vector.broadcast %8 : vector<8x1xf32> to vector<8x128xf32>
    %10 = arith.subf %6, %9 : vector<8x128xf32>
    %11 = math.exp %10 : vector<8x128xf32>
    %cst_6 = arith.constant dense<0.000000e+00> : vector<8xf32>
    %12 = vector.multi_reduction <add>, %11, %cst_6 [1] : vector<8x128xf32> to vector<8xf32>
    %13 = vector.shape_cast %12 : vector<8xf32> to vector<8x1xf32>
    %14 = math.log %13 : vector<8x1xf32>
    %15 = vector.broadcast %14 : vector<8x1xf32> to vector<8x128xf32>
    %16 = arith.subf %10, %15 : vector<8x128xf32>
    %c0_7 = arith.constant 0 : index
    %c0_8 = arith.constant 0 : index
    %17 = vector.load %arg4[%c0_7, %c0_8] : memref<8x128xf32, #tpu.memory_space<vmem>>, vector<8x128xf32>
    tpu.vector_store %arg4[%c0_7, %c0_8], %16 {strides = array<i32>} : memref<8x128xf32, #tpu.memory_space<vmem>>, vector<8x128xf32>,
    return
  }
  func.func @transform_0(%arg0: i32) -> (i32, i32) {
    %c0_i32 = arith.constant 0 : i32
    %c0_i32_0 = arith.constant 0 : i32
    return %arg0, %c0_i32 : i32, i32
  }
  func.func @transform_1(%arg0: i32) -> (i32, i32) {
    %c0_i32 = arith.constant 0 : i32
    %c0_i32_0 = arith.constant 0 : i32
    %c0_i32_1 = arith.constant 0 : i32
    return %c0_i32, %c0_i32_0 : i32, i32
  }
  func.func @transform_2(%arg0: i32) -> (i32, i32) {
    %c0_i32 = arith.constant 0 : i32
    %c0_i32_0 = arith.constant 0 : i32
    %c0_i32_1 = arith.constant 0 : i32
    return %c0_i32, %c0_i32_0 : i32, i32
  }
  func.func @transform_3(%arg0: i32) -> (i32, i32) {
    %c0_i32 = arith.constant 0 : i32
    %c0_i32_0 = arith.constant 0 : i32
    return %arg0, %c0_i32 : i32, i32
  }
}

</mosaic_0001>

<bundles_post_ra>
// kernel: tpu_custom_call.1
= control target key start
LH: loop header
LB: loop body
LE: loop exit
PB: predicated region body
PF: predicated region fallthrough
CT: control target
= control target key end

     0   :  { %8 = vsyncpa [#allocation3], 0  ;;  %s1093_s0 = inlined_call_operand.hbm [shape: f32[8,1024], index: 0, kind: input, shape index: {}]   ;;  %s1094_s1 = inlined_call_operand.hbm [shape: bf16[1024,128], index: 1, kind: input, shape index: {}]   ;;  %s1095_s2 = inlined_call_operand.vmem [shape: f32[1,128], index: 2, kind: input, shape index: {}]   ;;  %s1096_s3 = inlined_call_operand.hbm [shape: f32[8,128], index: 3, kind: output, shape index: {}]  }
   0x1   :  { %9 = vsyncpa [#allocation6], 0 }
   0x2   :  { %10 = vsyncpa [#allocation4], 0  ;;  %s1056_s12 = smov [#allocation2]   ;;  %s1057_s14 = smov [#allocation5]  }
   0x3   :  { %s17_s13 = sshll.u32 %s1056_s12, 4  ;;  %s26_s15 = sshll.u32 %s1057_s14, 4  ;;  %s18_s13 = int_to_ptr.vmem [resolvable:$true] %s17_s13  ;;  %s27_s15 = int_to_ptr.vmem [resolvable:$true] %s26_s15 }
   0x4   :  { %s998_s16 = scalar_lea.vmem %s18_s13, 1024  ;;  %p1003_p1 = scmp.lt.s32.totalorder %s18_s13, %s18_s13 }
   0x5   :  { %p999_p0 = scmp.ne.s32.totalorder %s18_s13, %s998_s16  ;;  %p1004_p2 = scmp.lt.s32.totalorder %s998_s16, %s998_s16 }
   0x7   :  { %p1005_p3 = por %p1004_p2, %p1003_p1 }
   0x9   :  { %p1006_p4 = pnand %p1005_p3, %p999_p0 }
   0xb   :  { %1009 = shalt.err (!%p1006_p4)
}
   0xc   :  { %20 = dma.hbm_to_vmem [thread:$0]  %s1093_s0, 1024, %s18_s13, [#allocation3]  }
   0xd   :  { %s1018_s19 = scalar_lea.vmem %s27_s15, 8192  ;;  %p1023_p6 = scmp.lt.s32.totalorder %s27_s15, %s27_s15 }
   0xe   :  { %p1019_p5 = scmp.ne.s32.totalorder %s27_s15, %s1018_s19  ;;  %p1024_p7 = scmp.lt.s32.totalorder %s1018_s19, %s1018_s19 }
  0x10   :  { %p1025_p8 = por %p1024_p7, %p1023_p6 }
  0x12   :  { %p1026_p9 = pnand %p1025_p8, %p1019_p5 }
  0x14   :  { %1029 = shalt.err (!%p1026_p9)
}
  0x15   :  { %s1058_s20 = smov 64   ;;  %s1059_s21 = smov 4  }
  0x16   :  { %32 = dma.hbm_to_vmem [thread:$0]  %s1094_s1, 8192, %s27_s15, [#allocation6], %s1058_s20, %s1058_s20, %s1059_s21  }
  0x17   :  { %1050 = dma.done.wait [#allocation3], 1024  }
  0x18   :  { %1051 = vsyncadd [#allocation3], 4294966272 }
  0x19   :  { %1052 = dma.done.wait [#allocation6], 8192  }
  0x1a   :  { %1053 = vsyncadd [#allocation6], 4294959104  ;;  %v922_v0 = vld [vmem:[#allocation5 + $0x78] sm:$0xff]   ;;  %v926_v4 = vld [vmem:[#allocation5 + $0x70] sm:$0xff]  }
  0x1b   :  { %v923_v1 = vld [vmem:[#allocation5 + $0xf8] sm:$0xff]   ;;  %829 = vmatprep.subr.bf16.mxu0 %v922_v0  ;;  %v927_v5 = vld [vmem:[#allocation5 + $0xf0] sm:$0xff]   ;;  %v930_v8 = vld [vmem:[#allocation5 + $0x68] sm:$0xff]  }
  0x1c   :  { %v924_v2 = vld [vmem:[#allocation5 + $0x38] sm:$0xff]   ;;  %851 = vmatprep.subr.bf16.mxu1 %v923_v1  ;;  %v928_v6 = vld [vmem:[#allocation5 + $0x30] sm:$0xff]   ;;  %v931_v9 = vld [vmem:[#allocation5 + $0xe8] sm:$0xff]  }
  0x1d   :  { %v925_v3 = vld [vmem:[#allocation5 + $0xb8] sm:$0xff]   ;;  %830 = vmatpush3.bf16.msra.mxu0 %v924_v2  ;;  %v929_v7 = vld [vmem:[#allocation5 + $0xb0] sm:$0xff]   ;;  %v932_v10 = vld [vmem:[#allocation5 + $0x28] sm:$0xff]  }
  0x1e   :  { %852 = vmatpush3.bf16.msra.mxu1 %v925_v3  ;;  %831 = vmatprep.subr.bf16.mxu0 %v926_v4  ;;  %v933_v11 = vld [vmem:[#allocation5 + $0xa8] sm:$0xff]   ;;  %v934_v12 = vld [vmem:[#allocation5 + $0x60] sm:$0xff]   ;;  %v938_v16 = vld [vmem:[#allocation5 + $0x58] sm:$0xff]  }
  0x1f   :  { %853 = vmatprep.subr.bf16.mxu1 %v927_v5  ;;  %v935_v13 = vld [vmem:[#allocation5 + $0xe0] sm:$0xff]   ;;  %v939_v17 = vld [vmem:[#allocation5 + $0xd8] sm:$0xff]   ;;  %v942_v20 = vld [vmem:[#allocation5 + $0x50] sm:$0xff]  }
  0x20   :  { %v936_v14 = vld [vmem:[#allocation5 + $0x20] sm:$0xff]   ;;  %v940_v18 = vld [vmem:[#allocation5 + $0x18] sm:$0xff]   ;;  %v943_v21 = vld [vmem:[#allocation5 + $0xd0] sm:$0xff]  }
  0x21   :  { %832 = vmatpush3.bf16.msra.mxu0 %v928_v6  ;;  %v937_v15 = vld [vmem:[#allocation5 + $0xa0] sm:$0xff]   ;;  %v941_v19 = vld [vmem:[#allocation5 + $0x98] sm:$0xff]   ;;  %v944_v22 = vld [vmem:[#allocation5 + $0x10] sm:$0xff]  }
  0x22   :  { %854 = vmatpush3.bf16.msra.mxu1 %v929_v7  ;;  %833 = vmatprep.subr.bf16.mxu0 %v930_v8  ;;  %v945_v23 = vld [vmem:[#allocation5 + $0x90] sm:$0xff]   ;;  %v946_v24 = vld [vmem:[#allocation5 + $0x48] sm:$0xff]   ;;  %v950_v28 = vld [vmem:[#allocation5 + $0x40] sm:$0xff]  }
  0x23   :  { %855 = vmatprep.subr.bf16.mxu1 %v931_v9  ;;  %v947_v25 = vld [vmem:[#allocation5 + $0xc8] sm:$0xff]   ;;  %v951_v29 = vld [vmem:[#allocation5 + $0xc0] sm:$0xff]   ;;  %v45_v33 = vld [vmem:[#allocation2 + $0x18] sm:$0xff] }
  0x24   :  { %v948_v26 = vld [vmem:[#allocation5 + $0x8] sm:$0xff]   ;;  %v952_v30 = vld [vmem:[#allocation5] sm:$0xff]   ;;  %v53_v36 = vpack.c.bf16 %v45_v33, %v45_v33  ;;  %v44_v38 = vld [vmem:[#allocation2 + $0x10] sm:$0xff] }
  0x25   :  { %834 = vmatpush3.bf16.msra.mxu0 %v932_v10  ;;  %v949_v27 = vld [vmem:[#allocation5 + $0x88] sm:$0xff]   ;;  %v953_v31 = vld [vmem:[#allocation5 + $0x80] sm:$0xff]   ;;  %v52_v39 = vpack.c.bf16 %v44_v38, %v44_v38  ;;  %v954_v40 = vld [vmem:[#allocation5 + $0x178] sm:$0xff]  }
  0x26   :  { %856 = vmatpush3.bf16.msra.mxu1 %v933_v11  ;;  %835 = vmatprep.subr.bf16.mxu0 %v934_v12  ;;  %v43_v32 = vld [vmem:[#allocation2 + $0x8] sm:$0xff]  ;;  %v42_v34 = vld [vmem:[#allocation2] sm:$0xff]  ;;  %v955_v41 = vld [vmem:[#allocation5 + $0x1f8] sm:$0xff]  }
  0x27   :  { %857 = vmatprep.subr.bf16.mxu1 %v935_v13  ;;  %v51_v35 = vpack.c.bf16 %v43_v32, %v43_v32  ;;  %v50_v37 = vpack.c.bf16 %v42_v34, %v42_v34  ;;  %649 = vmatprep.mubr.bf16.mxu1 %v53_v36  ;;  %v956_v42 = vld [vmem:[#allocation5 + $0x138] sm:$0xff]   ;;  %v958_v44 = vld [vmem:[#allocation5 + $0x170] sm:$0xff]   ;;  %v962_v48 = vld [vmem:[#allocation5 + $0x168] sm:$0xff]  }
  0x28   :  { %v957_v43 = vld [vmem:[#allocation5 + $0x1b8] sm:$0xff]   ;;  %v959_v45 = vld [vmem:[#allocation5 + $0x1f0] sm:$0xff]   ;;  %v963_v49 = vld [vmem:[#allocation5 + $0x1e8] sm:$0xff]  }
  0x29   :  { %836 = vmatpush3.bf16.msra.mxu0 %v936_v14  ;;  %609 = vmatprep.mubr.bf16.mxu0 %v51_v35  ;;  %v960_v46 = vld [vmem:[#allocation5 + $0x130] sm:$0xff]   ;;  %v964_v50 = vld [vmem:[#allocation5 + $0x128] sm:$0xff]   ;;  %v966_v52 = vld [vmem:[#allocation5 + $0x160] sm:$0xff]  }
  0x2a   :  { %858 = vmatpush3.bf16.msra.mxu1 %v937_v15  ;;  %837 = vmatprep.subr.bf16.mxu0 %v938_v16  ;;  %v961_v47 = vld [vmem:[#allocation5 + $0x1b0] sm:$0xff]   ;;  %v965_v51 = vld [vmem:[#allocation5 + $0x1a8] sm:$0xff]   ;;  %v967_v53 = vld [vmem:[#allocation5 + $0x1e0] sm:$0xff]  }
  0x2b   :  { %859 = vmatprep.subr.bf16.mxu1 %v939_v17  ;;  %v968_v54 = vld [vmem:[#allocation5 + $0x120] sm:$0xff]   ;;  %v970_v56 = vld [vmem:[#allocation5 + $0x158] sm:$0xff]   ;;  %v974_v60 = vld [vmem:[#allocation5 + $0x150] sm:$0xff]  }
  0x2c   :  { %v969_v55 = vld [vmem:[#allocation5 + $0x1a0] sm:$0xff]   ;;  %v971_v57 = vld [vmem:[#allocation5 + $0x1d8] sm:$0xff]   ;;  %v975_v61 = vld [vmem:[#allocation5 + $0x1d0] sm:$0xff]  }
  0x2d   :  { %838 = vmatpush3.bf16.msra.mxu0 %v940_v18  ;;  %v972_v58 = vld [vmem:[#allocation5 + $0x118] sm:$0xff]   ;;  %v976_v62 = vld [vmem:[#allocation5 + $0x110] sm:$0xff]   ;;  %v978_v0 = vld [vmem:[#allocation5 + $0x148] sm:$0xff]  }
  0x2e   :  { %860 = vmatpush3.bf16.msra.mxu1 %v941_v19  ;;  %839 = vmatprep.subr.bf16.mxu0 %v942_v20  ;;  %v973_v59 = vld [vmem:[#allocation5 + $0x198] sm:$0xff]   ;;  %v977_v63 = vld [vmem:[#allocation5 + $0x190] sm:$0xff]   ;;  %v979_v1 = vld [vmem:[#allocation5 + $0x1c8] sm:$0xff]  }
  0x2f   :  { %861 = vmatprep.subr.bf16.mxu1 %v943_v21  ;;  %v980_v2 = vld [vmem:[#allocation5 + $0x108] sm:$0xff]   ;;  %v982_v4 = vld [vmem:[#allocation5 + $0x140] sm:$0xff]   ;;  %v49_v9 = vld [vmem:[#allocation2 + $0x38] sm:$0xff] }
  0x30   :  { %v981_v3 = vld [vmem:[#allocation5 + $0x188] sm:$0xff]   ;;  %v983_v5 = vld [vmem:[#allocation5 + $0x1c0] sm:$0xff]   ;;  %v57_v11 = vpack.c.bf16 %v49_v9, %v49_v9  ;;  %v48_v13 = vld [vmem:[#allocation2 + $0x30] sm:$0xff] }
  0x31   :  { %840 = vmatpush3.bf16.msra.mxu0 %v944_v22  ;;  %v984_v6 = vld [vmem:[#allocation5 + $0x100] sm:$0xff]   ;;  %v47_v8 = vld [vmem:[#allocation2 + $0x28] sm:$0xff]  ;;  %v56_v15 = vpack.c.bf16 %v48_v13, %v48_v13 }
  0x32   :  { %862 = vmatpush3.bf16.msra.mxu1 %v945_v23  ;;  %841 = vmatprep.subr.bf16.mxu0 %v946_v24  ;;  %v985_v7 = vld [vmem:[#allocation5 + $0x180] sm:$0xff]   ;;  %v55_v10 = vpack.c.bf16 %v47_v8, %v47_v8 }
  0x33   :  { %863 = vmatprep.subr.bf16.mxu1 %v947_v25  ;;  %v46_v12 = vld [vmem:[#allocation2 + $0x20] sm:$0xff] }
  0x34   :  { %v54_v14 = vpack.c.bf16 %v46_v12, %v46_v12  ;;  %v764_v25 = vld [vmem:[%s1095_s2] ss:$0 sm:$0xff]  ;;  %s1060_s2 = smov [#allocation7]  }
  0x35   :  { %842 = vmatpush3.bf16.msra.mxu0 %v948_v26  ;;  %s754_s24 = sshll.u32 %s1060_s2, 4  ;;  %s755_s24 = int_to_ptr.vmem [resolvable:$true] %s754_s24 }
  0x36   :  { %864 = vmatpush3.bf16.msra.mxu1 %v949_v27  ;;  %843 = vmatprep.subr.bf16.mxu0 %v950_v28  ;;  %s1030_s25 = scalar_lea.vmem %s755_s24, 128  ;;  %p1035_p11 = scmp.lt.s32.totalorder %s755_s24, %s755_s24 }
  0x37   :  { %865 = vmatprep.subr.bf16.mxu1 %v951_v29  ;;  %p1031_p10 = scmp.ne.s32.totalorder %s755_s24, %s1030_s25  ;;  %p1036_p12 = scmp.lt.s32.totalorder %s1030_s25, %s1030_s25 }
  0x39   :  { %844 = vmatpush3.bf16.msra.mxu0 %v952_v30  ;;  %p1037_p13 = por %p1036_p12, %p1035_p11 }
  0x3a   :  { %866 = vmatpush3.bf16.msra.mxu1 %v953_v31  ;;  %873 = vmatprep.subr.bf16.mxu0 %v954_v40 }
  0x3b   :  { %895 = vmatprep.subr.bf16.mxu1 %v955_v41  ;;  %p1038_p0 = pnand %p1037_p13, %p1031_p10 }
  0x3c   :  { %610 = vmatmul.mubr.bf16.vlgmr.msra.gmra.mxu0 %v50_v37 }
  0x3d   :  { %650 = vmatmul.mubr.bf16.vlgmr.msra.gmra.mxu1 %v52_v39  ;;  %874 = vmatpush3.bf16.msra.mxu0 %v956_v42 }
  0x3e   :  { %896 = vmatpush3.bf16.msra.mxu1 %v957_v43  ;;  %875 = vmatprep.subr.bf16.mxu0 %v958_v44 }
  0x3f   :  { %897 = vmatprep.subr.bf16.mxu1 %v959_v45  ;;  %689 = vmatprep.mubr.bf16.mxu0 %v55_v10 }
  0x40   :  { %729 = vmatprep.mubr.bf16.mxu1 %v57_v11 }
  0x41   :  { %876 = vmatpush3.bf16.msra.mxu0 %v960_v46 }
  0x42   :  { %898 = vmatpush3.bf16.msra.mxu1 %v961_v47  ;;  %877 = vmatprep.subr.bf16.mxu0 %v962_v48 }
  0x43   :  { %899 = vmatprep.subr.bf16.mxu1 %v963_v49 }
  0x45   :  { %878 = vmatpush3.bf16.msra.mxu0 %v964_v50 }
  0x46   :  { %900 = vmatpush3.bf16.msra.mxu1 %v965_v51  ;;  %879 = vmatprep.subr.bf16.mxu0 %v966_v52 }
  0x47   :  { %901 = vmatprep.subr.bf16.mxu1 %v967_v53 }
  0x49   :  { %880 = vmatpush3.bf16.msra.mxu0 %v968_v54 }
  0x4a   :  { %902 = vmatpush3.bf16.msra.mxu1 %v969_v55  ;;  %881 = vmatprep.subr.bf16.mxu0 %v970_v56 }
  0x4b   :  { %903 = vmatprep.subr.bf16.mxu1 %v971_v57 }
  0x4d   :  { %882 = vmatpush3.bf16.msra.mxu0 %v972_v58 }
  0x4e   :  { %904 = vmatpush3.bf16.msra.mxu1 %v973_v59  ;;  %883 = vmatprep.subr.bf16.mxu0 %v974_v60 }
  0x4f   :  { %905 = vmatprep.subr.bf16.mxu1 %v975_v61 }
  0x51   :  { %884 = vmatpush3.bf16.msra.mxu0 %v976_v62 }
  0x52   :  { %906 = vmatpush3.bf16.msra.mxu1 %v977_v63  ;;  %885 = vmatprep.subr.bf16.mxu0 %v978_v0 }
  0x53   :  { %907 = vmatprep.subr.bf16.mxu1 %v979_v1 }
  0x55   :  { %886 = vmatpush3.bf16.msra.mxu0 %v980_v2 }
  0x56   :  { %908 = vmatpush3.bf16.msra.mxu1 %v981_v3  ;;  %887 = vmatprep.subr.bf16.mxu0 %v982_v4 }
  0x57   :  { %909 = vmatprep.subr.bf16.mxu1 %v983_v5 }
  0x59   :  { %888 = vmatpush3.bf16.msra.mxu0 %v984_v6 }
  0x5a   :  { %910 = vmatpush3.bf16.msra.mxu1 %v985_v7 }
  0x5c   :  { %690 = vmatmul.mubr.bf16.vlgmr.msra.gmra.mxu0 %v54_v14 }
  0x5d   :  { %730 = vmatmul.mubr.bf16.vlgmr.msra.gmra.mxu1 %v56_v15 }
  0xfc   :  { %v845_v16 = vpop.f32.mrf.mxu0 }
  0xfd   :  { %v867_v17 = vpop.f32.mrf.mxu1 }
  0xfe   :  { %v846_v18 = vpop.f32.mrf.mxu0 }
  0xff   :  { %v868_v19 = vpop.f32.mrf.mxu1  ;;  %v847_v24 = vadd.f32 %v846_v18, %v845_v16 }
 0x100   :  { %v848_v20 = vpop.f32.mrf.mxu0  ;;  %v869_v27 = vadd.f32 %v868_v19, %v867_v17 }
 0x101   :  { %v870_v21 = vpop.f32.mrf.mxu1  ;;  %v612_v26 = vadd.f32 %v847_v24, %v764_v25 }
 0x102   :  { %v849_v22 = vpop.f32.mrf.mxu0 }
 0x103   :  { %v871_v23 = vpop.f32.mrf.mxu1  ;;  %v652_v31 = vadd.f32 %v869_v27, %v612_v26 }
 0x11c   :  { %v889_v28 = vpop.f32.mrf.mxu0 }
 0x11d   :  { %v911_v29 = vpop.f32.mrf.mxu1 }
 0x11e   :  { %v890_v30 = vpop.f32.mrf.mxu0 }
 0x11f   :  { %v891_v32 = vadd.f32 %v890_v30, %v889_v28  ;;  %v912_v33 = vpop.f32.mrf.mxu1 }
 0x120   :  { %v892_v34 = vpop.f32.mrf.mxu0  ;;  %v913_v36 = vadd.f32 %v912_v33, %v911_v29 }
 0x121   :  { %v692_v35 = vadd.f32 %v891_v32, %v652_v31  ;;  %v914_v37 = vpop.f32.mrf.mxu1 }
 0x122   :  { %v893_v38 = vpop.f32.mrf.mxu0 }
 0x123   :  { %v915_v39 = vpop.f32.mrf.mxu1  ;;  %v732_v40 = vadd.f32 %v913_v36, %v692_v35 }
 0x125   :  { %737 = vmax.xlane.f32.xlu0 %v732_v40 }
 0x1ae   :  { %v738_v41 = vpop.xlane.xlu0 %737 }
 0x1af   :  { %v739_v42 = vsub.f32 %v732_v40, %v738_v41 }
 0x1b1   :  { %v740_v43 = vmul.f32 1.442695, %v739_v42 }
 0x1b3   :  { %986 = vpow2.f32 %v740_v43 }
 0x1c0   :  { %v987_v44 = vpop.eup %986 }
 0x1c1   :  { %742 = vadd.xlane.f32.xlu0 %v987_v44 }
 0x24a   :  { %v743_v45 = vpop.xlane.xlu0 %742 }
 0x24b   :  { %988 = vlog2.f32 %v743_v45 }
 0x258   :  { %v989_v46 = vpop.eup %988 }
 0x259   :  { %v745_v47 = vmul.f32 0.6931472, %v989_v46 }
 0x25b   :  { %v746_v48 = vsub.f32 %v739_v42, %v745_v47 }
 0x25d   :  { %747 = vst [vmem:[#allocation7] sm:$0xff] %v746_v48 }
 0x25e   :  { %1041 = shalt.err (!%p1038_p0)
}
 0x25f   :  { %757 = dma.vmem_to_hbm [thread:$0]  %s755_s24, 128, %s1096_s3, [#allocation4]  }
 0x260   :  { %1054 = dma.done.wait [#allocation4], 128  }
 0x261   :  { %1055 = vsyncadd [#allocation4], 4294967168 }
 0x262   :  { %761 = vsyncpa [#allocation3], 1 }
 0x263   :  { %762 = vsyncpa [#allocation6], 1 }
 0x264   :  { %763 = vsyncpa [#allocation4], 1 }

</bundles_post_ra>
